<compile_context>
chip_gen: v5e
topology: v5e:2x2
jax: 0.10.0
libtpu: 0.0.40
codegen_flags: <defaults>
</compile_context>

<pallas_src>
import jax
import jax.numpy as jnp
from jax.experimental import pallas as pl
from jax.experimental.pallas import tpu as pltpu


# --------------------------------------------------------------------------
# Pass 1: fused QKV projection -> head-major q/k/v (q pre-scaled by 1/sqrt(hd))
# --------------------------------------------------------------------------
def qkv_proj_kernel(x_ref, wqkv_ref, bqkv_ref, q_ref, k_ref, v_ref):
    # x_ref block: (1, tt, C); q/k/v blocks: (1, H, tt, hd)
    n_heads = q_ref.shape[1]
    hd = q_ref.shape[3]
    C = x_ref.shape[2]
    scale = 1.0 / (hd ** 0.5)

    x = x_ref[0].astype(jnp.bfloat16)            # (tt, C)  bf16 MXU input
    w = wqkv_ref[...].astype(jnp.bfloat16)       # (C, 3C)
    # MXU matmul, f32 accumulation; bias add in f32.
    qkv = jnp.dot(x, w, preferred_element_type=jnp.float32) + bqkv_ref[...]

    q = qkv[:, 0 * C:1 * C] * jnp.float32(scale)   # fold 1/sqrt(hd) into q
    k = qkv[:, 1 * C:2 * C]
    v = qkv[:, 2 * C:3 * C]

    # Layout plumbing only: scatter per-head slices into the head-major output.
    for h in range(n_heads):
        sl = slice(h * hd, (h + 1) * hd)
        q_ref[0, h] = q[:, sl].astype(q_ref.dtype)
        k_ref[0, h] = k[:, sl].astype(k_ref.dtype)
        v_ref[0, h] = v[:, sl].astype(v_ref.dtype)


# --------------------------------------------------------------------------
# Pass 2: flash attention (online softmax) + fused output projection
# --------------------------------------------------------------------------
def flash_attn_proj_kernel(q_ref, k_ref, v_ref, wproj_ref, bproj_ref, o_ref,
                           m_scr, l_scr, acc_scr):
    # q block: (1, H, tq, hd); k/v blocks: (1, H, tk, hd); o block: (1, tq, C)
    n_heads = q_ref.shape[1]
    block_q = q_ref.shape[2]
    block_k = k_ref.shape[2]

    qi = pl.program_id(1)
    ki = pl.program_id(2)

    @pl.when(ki == 0)
    def _init():
        m_scr[...] = jnp.full(m_scr.shape, -jnp.inf, dtype=m_scr.dtype)
        l_scr[...] = jnp.zeros(l_scr.shape, dtype=l_scr.dtype)
        acc_scr[...] = jnp.zeros(acc_scr.shape, dtype=acc_scr.dtype)

    q_start = qi * block_q
    k_start = ki * block_k

    # Skip KV blocks that lie entirely above the causal diagonal.
    @pl.when(k_start < q_start + block_q)
    def _update():
        q = q_ref[0]                              # (H, tq, hd) bf16, pre-scaled
        k = k_ref[0]                              # (H, tk, hd) bf16
        v = v_ref[0]                              # (H, tk, hd) bf16

        # All heads in one batched MXU matmul, f32 accumulation.
        s = jnp.einsum('hqd,hkd->hqk', q, k,
                       preferred_element_type=jnp.float32)   # (H, tq, tk)

        row = q_start + jax.lax.broadcasted_iota(jnp.int32, (block_q, block_k), 0)
        col = k_start + jax.lax.broadcasted_iota(jnp.int32, (block_q, block_k), 1)
        # Finite fill (not -inf) so a partially/fully masked block never NaNs.
        s = jnp.where((row >= col)[None], s, jnp.float32(-1e30))

        # Online softmax update (all softmax math in f32).
        m_prev = m_scr[...]                                   # (H, tq, 1)
        m_new = jnp.maximum(m_prev, jnp.max(s, axis=-1, keepdims=True))
        alpha = jnp.exp(m_prev - m_new)
        p = jnp.exp(s - m_new)                                # (H, tq, tk) f32
        l_scr[...] = alpha * l_scr[...] + jnp.sum(p, axis=-1, keepdims=True)
        acc_scr[...] = alpha * acc_scr[...] + jnp.einsum(
            'hqk,hkd->hqd', p.astype(v.dtype), v,
            preferred_element_type=jnp.float32)               # (H, tq, hd) f32
        m_scr[...] = m_new

    @pl.when(ki == pl.num_programs(2) - 1)
    def _finalize():
        inv_l = pl.reciprocal(l_scr[...], approx=True)        # EUP reciprocal
        acc = acc_scr[...] * inv_l                            # (H, tq, hd)
        # Merge heads -> (tq, C). Static slices; one relayout per q tile.
        y = jnp.concatenate([acc[h] for h in range(n_heads)], axis=-1)
        # Fused output projection; lane-dense (tq, C) store.
        out = jnp.dot(y.astype(jnp.bfloat16),
                      wproj_ref[...].astype(jnp.bfloat16),
                      preferred_element_type=jnp.float32) + bproj_ref[...]
        o_ref[0] = out.astype(o_ref.dtype)


# --------------------------------------------------------------------------
# Wrapper
# --------------------------------------------------------------------------
def causal_self_attention(x, w_qkv, b_qkv, w_proj, b_proj, n_heads):
    B, T, C = x.shape
    assert C % n_heads == 0
    hd = C // n_heads

    # Sequence tiling; 128 at realistic T (re-derive per generation if needed),
    # full T for small sequences.
    block_t = T if T <= 128 else 128
    assert T % block_t == 0, "T must be a multiple of the sequence tile"
    block_q = block_t
    block_k = block_t

    # 48 MiB scoped VMEM: above the 16/32 MiB defaults, under v7x's 64 MiB.
    vmem_bytes = 48 * 1024 * 1024

    # ---- Pass 1: QKV projection -> (B, H, T, hd) bf16, q pre-scaled --------
    qkv_specs = [
        pl.BlockSpec((1, n_heads, block_t, hd), lambda b, i: (b, 0, i, 0))
        for _ in range(3)
    ]
    q, k, v = pl.pallas_call(
        qkv_proj_kernel,
        out_shape=(
            jax.ShapeDtypeStruct((B, n_heads, T, hd), jnp.bfloat16),
            jax.ShapeDtypeStruct((B, n_heads, T, hd), jnp.bfloat16),
            jax.ShapeDtypeStruct((B, n_heads, T, hd), jnp.bfloat16),
        ),
        grid_spec=pltpu.PrefetchScalarGridSpec(
            num_scalar_prefetch=0,
            grid=(B, T // block_t),
            in_specs=[
                pl.BlockSpec((1, block_t, C), lambda b, i: (b, i, 0)),   # x
                pl.BlockSpec((C, 3 * C), lambda b, i: (0, 0)),           # W_qkv (constant block)
                pl.BlockSpec((1, 3 * C), lambda b, i: (0, 0)),           # b_qkv
            ],
            out_specs=qkv_specs,
        ),
        compiler_params=pltpu.CompilerParams(
            dimension_semantics=("parallel", "parallel"),
            vmem_limit_bytes=vmem_bytes,
        ),
    )(x, w_qkv, b_qkv.reshape(1, 3 * C))

    # ---- Pass 2: flash attention + output projection -----------------------
    out = pl.pallas_call(
        flash_attn_proj_kernel,
        out_shape=jax.ShapeDtypeStruct((B, T, C), x.dtype),
        grid_spec=pltpu.PrefetchScalarGridSpec(
            num_scalar_prefetch=0,
            grid=(B, T // block_q, T // block_k),
            in_specs=[
                pl.BlockSpec((1, n_heads, block_q, hd),
                             lambda b, qi, ki: (b, 0, qi, 0)),           # q
                pl.BlockSpec((1, n_heads, block_k, hd),
                             lambda b, qi, ki: (b, 0, ki, 0)),           # k
                pl.BlockSpec((1, n_heads, block_k, hd),
                             lambda b, qi, ki: (b, 0, ki, 0)),           # v
                pl.BlockSpec((C, C), lambda b, qi, ki: (0, 0)),          # W_proj (constant block)
                pl.BlockSpec((1, C), lambda b, qi, ki: (0, 0)),          # b_proj
            ],
            out_specs=pl.BlockSpec((1, block_q, C),
                                   lambda b, qi, ki: (b, qi, 0)),
            scratch_shapes=[
                pltpu.VMEM((n_heads, block_q, 1), jnp.float32),          # m
                pltpu.VMEM((n_heads, block_q, 1), jnp.float32),          # l
                pltpu.VMEM((n_heads, block_q, hd), jnp.float32),         # acc
            ],
        ),
        compiler_params=pltpu.CompilerParams(
            dimension_semantics=("parallel", "parallel", "arbitrary"),
            vmem_limit_bytes=vmem_bytes,
        ),
    )(q, k, v, w_proj, b_proj.reshape(1, C))
    return out


# --------------------------------------------------------------------------
# Pure-JAX reference (f32 everywhere), matching the PyTorch module
# --------------------------------------------------------------------------
def reference(x, w_qkv, b_qkv, w_proj, b_proj, n_heads):
    B, T, C = x.shape
    hd = C // n_heads
    qkv = x @ w_qkv + b_qkv
    q, k, v = jnp.split(qkv, 3, axis=-1)
    q = q.reshape(B, T, n_heads, hd).transpose(0, 2, 1, 3)
    k = k.reshape(B, T, n_heads, hd).transpose(0, 2, 1, 3)
    v = v.reshape(B, T, n_heads, hd).transpose(0, 2, 1, 3)
    attn = jnp.einsum("bhqd,bhkd->bhqk", q, k) / (hd ** 0.5)
    mask = jnp.tril(jnp.ones((T, T), dtype=bool))
    attn = jnp.where(mask[None, None], attn, -jnp.inf)
    attn = jax.nn.softmax(attn, axis=-1)
    y = jnp.einsum("bhqk,bhkd->bhqd", attn, v)
    y = y.transpose(0, 2, 1, 3).reshape(B, T, C)
    return y @ w_proj + b_proj


if __name__ == "__main__":
    # Small shapes consistent with the module: B=2, T(seq)=8, d_model=32, 4 heads.
    B, T, C, n_heads = 2, 8, 32, 4

    key = jax.random.PRNGKey(0)
    kx, k1, k2, k3, k4 = jax.random.split(key, 5)

    x = jax.random.normal(kx, (B, T, C), dtype=jnp.float32)

    # Deterministic parameter init (uniform +-1/sqrt(fan_in), like nn.Linear default).
    bound = 1.0 / (C ** 0.5)
    w_qkv = jax.random.uniform(k1, (C, 3 * C), jnp.float32, -bound, bound)
    b_qkv = jax.random.uniform(k2, (3 * C,), jnp.float32, -bound, bound)
    w_proj = jax.random.uniform(k3, (C, C), jnp.float32, -bound, bound)
    b_proj = jax.random.uniform(k4, (C,), jnp.float32, -bound, bound)

    out = causal_self_attention(x, w_qkv, b_qkv, w_proj, b_proj, n_heads)
    out = jax.block_until_ready(out)

    ref = reference(x, w_qkv, b_qkv, w_proj, b_proj, n_heads)
    assert out.shape == (B, T, C)
    # Tolerance loosened vs f32 reference because MXU inputs are bf16
    # (accumulation stays f32, so the error is bounded).
    assert jnp.allclose(out, ref, atol=5e-2, rtol=5e-2), "mismatch vs reference"

    print("KERNEL_OK")
</pallas_src>

<mosaic_0001>
module attributes {stable_mosaic.version = 11 : i64} {
  func.func @qkv_proj_kernel(%arg0: i32, %arg1: i32, %arg2: memref<1x8x32xf32, #tpu.memory_space<vmem>>, %arg3: memref<32x96xf32, #tpu.memory_space<vmem>>, %arg4: memref<1x96xf32, #tpu.memory_space<vmem>>, %arg5: memref<1x4x8x8xbf16, #tpu.memory_space<vmem>>, %arg6: memref<1x4x8x8xbf16, #tpu.memory_space<vmem>>, %arg7: memref<1x4x8x8xbf16, #tpu.memory_space<vmem>>) attributes {dimension_semantics = [#tpu.dimension_semantics<parallel>, #tpu.dimension_semantics<parallel>], iteration_bounds = array<i64: 2, 1>, scalar_prefetch = 0 : i64, scratch_operands = 0 : i64, tpu.core_type = #tpu.core_type<tc>, window_params = [{transform_indices = @transform_0, window_bounds = array<i64: 1, 8, 32>}, {pipeline_mode = #tpu.pipeline_mode<synchronous>, transform_indices = @transform_1, window_bounds = array<i64: 32, 96>}, {pipeline_mode = #tpu.pipeline_mode<synchronous>, transform_indices = @transform_2, window_bounds = array<i64: 1, 96>}, {transform_indices = @transform_3, window_bounds = array<i64: 1, 4, 8, 8>}, {transform_indices = @transform_4, window_bounds = array<i64: 1, 4, 8, 8>}, {transform_indices = @transform_5, window_bounds = array<i64: 1, 4, 8, 8>}]} {
    %c0 = arith.constant 0 : index
    %c0_0 = arith.constant 0 : index
    %c0_1 = arith.constant 0 : index
    %0 = vector.load %arg2[%c0, %c0_0, %c0_1] : memref<1x8x32xf32, #tpu.memory_space<vmem>>, vector<1x8x32xf32>
    %1 = vector.shape_cast %0 : vector<1x8x32xf32> to vector<8x32xf32>
    %2 = arith.truncf %1 : vector<8x32xf32> to vector<8x32xbf16>
    %c0_2 = arith.constant 0 : index
    %c0_3 = arith.constant 0 : index
    %3 = vector.load %arg3[%c0_2, %c0_3] : memref<32x96xf32, #tpu.memory_space<vmem>>, vector<32x96xf32>
    %4 = arith.truncf %3 : vector<32x96xf32> to vector<32x96xbf16>
    %cst = arith.constant dense<0.000000e+00> : vector<8x96xf32>
    %5 = tpu.matmul %2, %4, %cst {dimension_numbers = #tpu.dot_dimension_numbers<[1], [0], [0], [1], [0, 0, 1, 1], [], []>} : vector<8x32xbf16>, vector<32x96xbf16>, vector<8x96xf32> -> vector<8x96xf32>
    %c0_4 = arith.constant 0 : index
    %c0_5 = arith.constant 0 : index
    %6 = vector.load %arg4[%c0_4, %c0_5] : memref<1x96xf32, #tpu.memory_space<vmem>>, vector<1x96xf32>
    %7 = vector.broadcast %6 : vector<1x96xf32> to vector<8x96xf32>
    %8 = arith.addf %5, %7 : vector<8x96xf32>
    %9 = vector.extract_strided_slice %8 {offsets = [0, 0], sizes = [8, 32], strides = [1, 1]} : vector<8x96xf32> to vector<8x32xf32>
    %cst_6 = arith.constant 0.353553385 : f32
    %10 = vector.broadcast %cst_6 : f32 to vector<8x32xf32>
    %11 = arith.mulf %9, %10 : vector<8x32xf32>
    %12 = vector.extract_strided_slice %8 {offsets = [0, 32], sizes = [8, 32], strides = [1, 1]} : vector<8x96xf32> to vector<8x32xf32>
    %13 = vector.extract_strided_slice %8 {offsets = [0, 64], sizes = [8, 32], strides = [1, 1]} : vector<8x96xf32> to vector<8x32xf32>
    %14 = vector.extract_strided_slice %11 {offsets = [0, 0], sizes = [8, 8], strides = [1, 1]} : vector<8x32xf32> to vector<8x8xf32>
    %15 = arith.truncf %14 : vector<8x8xf32> to vector<8x8xbf16>
    %c0_7 = arith.constant 0 : index
    %c0_8 = arith.constant 0 : index
    %c0_9 = arith.constant 0 : index
    %c0_10 = arith.constant 0 : index
    %16 = vector.load %arg5[%c0_7, %c0_8, %c0_9, %c0_10] : memref<1x4x8x8xbf16, #tpu.memory_space<vmem>>, vector<1x1x8x8xbf16>
    %17 = vector.shape_cast %16 : vector<1x1x8x8xbf16> to vector<8x8xbf16>
    %18 = vector.shape_cast %15 : vector<8x8xbf16> to vector<1x1x8x8xbf16>
    tpu.vector_store %arg5[%c0_7, %c0_8, %c0_9, %c0_10], %18 {strides = array<i32>} : memref<1x4x8x8xbf16, #tpu.memory_space<vmem>>, vector<1x1x8x8xbf16>,
    %19 = vector.extract_strided_slice %12 {offsets = [0, 0], sizes = [8, 8], strides = [1, 1]} : vector<8x32xf32> to vector<8x8xf32>
    %20 = arith.truncf %19 : vector<8x8xf32> to vector<8x8xbf16>
    %c0_11 = arith.constant 0 : index
    %c0_12 = arith.constant 0 : index
    %c0_13 = arith.constant 0 : index
    %c0_14 = arith.constant 0 : index
    %21 = vector.load %arg6[%c0_11, %c0_12, %c0_13, %c0_14] : memref<1x4x8x8xbf16, #tpu.memory_space<vmem>>, vector<1x1x8x8xbf16>
    %22 = vector.shape_cast %21 : vector<1x1x8x8xbf16> to vector<8x8xbf16>
    %23 = vector.shape_cast %20 : vector<8x8xbf16> to vector<1x1x8x8xbf16>
    tpu.vector_store %arg6[%c0_11, %c0_12, %c0_13, %c0_14], %23 {strides = array<i32>} : memref<1x4x8x8xbf16, #tpu.memory_space<vmem>>, vector<1x1x8x8xbf16>,
    %24 = vector.extract_strided_slice %13 {offsets = [0, 0], sizes = [8, 8], strides = [1, 1]} : vector<8x32xf32> to vector<8x8xf32>
    %25 = arith.truncf %24 : vector<8x8xf32> to vector<8x8xbf16>
    %c0_15 = arith.constant 0 : index
    %c0_16 = arith.constant 0 : index
    %c0_17 = arith.constant 0 : index
    %c0_18 = arith.constant 0 : index
    %26 = vector.load %arg7[%c0_15, %c0_16, %c0_17, %c0_18] : memref<1x4x8x8xbf16, #tpu.memory_space<vmem>>, vector<1x1x8x8xbf16>
    %27 = vector.shape_cast %26 : vector<1x1x8x8xbf16> to vector<8x8xbf16>
    %28 = vector.shape_cast %25 : vector<8x8xbf16> to vector<1x1x8x8xbf16>
    tpu.vector_store %arg7[%c0_15, %c0_16, %c0_17, %c0_18], %28 {strides = array<i32>} : memref<1x4x8x8xbf16, #tpu.memory_space<vmem>>, vector<1x1x8x8xbf16>,
    %29 = vector.extract_strided_slice %11 {offsets = [0, 8], sizes = [8, 8], strides = [1, 1]} : vector<8x32xf32> to vector<8x8xf32>
    %30 = arith.truncf %29 : vector<8x8xf32> to vector<8x8xbf16>
    %c0_19 = arith.constant 0 : index
    %c1 = arith.constant 1 : index
    %c0_20 = arith.constant 0 : index
    %c0_21 = arith.constant 0 : index
    %31 = vector.load %arg5[%c0_19, %c1, %c0_20, %c0_21] : memref<1x4x8x8xbf16, #tpu.memory_space<vmem>>, vector<1x1x8x8xbf16>
    %32 = vector.shape_cast %31 : vector<1x1x8x8xbf16> to vector<8x8xbf16>
    %33 = vector.shape_cast %30 : vector<8x8xbf16> to vector<1x1x8x8xbf16>
    tpu.vector_store %arg5[%c0_19, %c1, %c0_20, %c0_21], %33 {strides = array<i32>} : memref<1x4x8x8xbf16, #tpu.memory_space<vmem>>, vector<1x1x8x8xbf16>,
    %34 = vector.extract_strided_slice %12 {offsets = [0, 8], sizes = [8, 8], strides = [1, 1]} : vector<8x32xf32> to vector<8x8xf32>
    %35 = arith.truncf %34 : vector<8x8xf32> to vector<8x8xbf16>
    %c0_22 = arith.constant 0 : index
    %c1_23 = arith.constant 1 : index
    %c0_24 = arith.constant 0 : index
    %c0_25 = arith.constant 0 : index
    %36 = vector.load %arg6[%c0_22, %c1_23, %c0_24, %c0_25] : memref<1x4x8x8xbf16, #tpu.memory_space<vmem>>, vector<1x1x8x8xbf16>
    %37 = vector.shape_cast %36 : vector<1x1x8x8xbf16> to vector<8x8xbf16>
    %38 = vector.shape_cast %35 : vector<8x8xbf16> to vector<1x1x8x8xbf16>
    tpu.vector_store %arg6[%c0_22, %c1_23, %c0_24, %c0_25], %38 {strides = array<i32>} : memref<1x4x8x8xbf16, #tpu.memory_space<vmem>>, vector<1x1x8x8xbf16>,
    %39 = vector.extract_strided_slice %13 {offsets = [0, 8], sizes = [8, 8], strides = [1, 1]} : vector<8x32xf32> to vector<8x8xf32>
    %40 = arith.truncf %39 : vector<8x8xf32> to vector<8x8xbf16>
    %c0_26 = arith.constant 0 : index
    %c1_27 = arith.constant 1 : index
    %c0_28 = arith.constant 0 : index
    %c0_29 = arith.constant 0 : index
    %41 = vector.load %arg7[%c0_26, %c1_27, %c0_28, %c0_29] : memref<1x4x8x8xbf16, #tpu.memory_space<vmem>>, vector<1x1x8x8xbf16>
    %42 = vector.shape_cast %41 : vector<1x1x8x8xbf16> to vector<8x8xbf16>
    %43 = vector.shape_cast %40 : vector<8x8xbf16> to vector<1x1x8x8xbf16>
    tpu.vector_store %arg7[%c0_26, %c1_27, %c0_28, %c0_29], %43 {strides = array<i32>} : memref<1x4x8x8xbf16, #tpu.memory_space<vmem>>, vector<1x1x8x8xbf16>,
    %44 = vector.extract_strided_slice %11 {offsets = [0, 16], sizes = [8, 8], strides = [1, 1]} : vector<8x32xf32> to vector<8x8xf32>
    %45 = arith.truncf %44 : vector<8x8xf32> to vector<8x8xbf16>
    %c0_30 = arith.constant 0 : index
    %c2 = arith.constant 2 : index
    %c0_31 = arith.constant 0 : index
    %c0_32 = arith.constant 0 : index
    %46 = vector.load %arg5[%c0_30, %c2, %c0_31, %c0_32] : memref<1x4x8x8xbf16, #tpu.memory_space<vmem>>, vector<1x1x8x8xbf16>
    %47 = vector.shape_cast %46 : vector<1x1x8x8xbf16> to vector<8x8xbf16>
    %48 = vector.shape_cast %45 : vector<8x8xbf16> to vector<1x1x8x8xbf16>
    tpu.vector_store %arg5[%c0_30, %c2, %c0_31, %c0_32], %48 {strides = array<i32>} : memref<1x4x8x8xbf16, #tpu.memory_space<vmem>>, vector<1x1x8x8xbf16>,
    %49 = vector.extract_strided_slice %12 {offsets = [0, 16], sizes = [8, 8], strides = [1, 1]} : vector<8x32xf32> to vector<8x8xf32>
    %50 = arith.truncf %49 : vector<8x8xf32> to vector<8x8xbf16>
    %c0_33 = arith.constant 0 : index
    %c2_34 = arith.constant 2 : index
    %c0_35 = arith.constant 0 : index
    %c0_36 = arith.constant 0 : index
    %51 = vector.load %arg6[%c0_33, %c2_34, %c0_35, %c0_36] : memref<1x4x8x8xbf16, #tpu.memory_space<vmem>>, vector<1x1x8x8xbf16>
    %52 = vector.shape_cast %51 : vector<1x1x8x8xbf16> to vector<8x8xbf16>
    %53 = vector.shape_cast %50 : vector<8x8xbf16> to vector<1x1x8x8xbf16>
    tpu.vector_store %arg6[%c0_33, %c2_34, %c0_35, %c0_36], %53 {strides = array<i32>} : memref<1x4x8x8xbf16, #tpu.memory_space<vmem>>, vector<1x1x8x8xbf16>,
    %54 = vector.extract_strided_slice %13 {offsets = [0, 16], sizes = [8, 8], strides = [1, 1]} : vector<8x32xf32> to vector<8x8xf32>
    %55 = arith.truncf %54 : vector<8x8xf32> to vector<8x8xbf16>
    %c0_37 = arith.constant 0 : index
    %c2_38 = arith.constant 2 : index
    %c0_39 = arith.constant 0 : index
    %c0_40 = arith.constant 0 : index
    %56 = vector.load %arg7[%c0_37, %c2_38, %c0_39, %c0_40] : memref<1x4x8x8xbf16, #tpu.memory_space<vmem>>, vector<1x1x8x8xbf16>
    %57 = vector.shape_cast %56 : vector<1x1x8x8xbf16> to vector<8x8xbf16>
    %58 = vector.shape_cast %55 : vector<8x8xbf16> to vector<1x1x8x8xbf16>
    tpu.vector_store %arg7[%c0_37, %c2_38, %c0_39, %c0_40], %58 {strides = array<i32>} : memref<1x4x8x8xbf16, #tpu.memory_space<vmem>>, vector<1x1x8x8xbf16>,
    %59 = vector.extract_strided_slice %11 {offsets = [0, 24], sizes = [8, 8], strides = [1, 1]} : vector<8x32xf32> to vector<8x8xf32>
    %60 = arith.truncf %59 : vector<8x8xf32> to vector<8x8xbf16>
    %c0_41 = arith.constant 0 : index
    %c3 = arith.constant 3 : index
    %c0_42 = arith.constant 0 : index
    %c0_43 = arith.constant 0 : index
    %61 = vector.load %arg5[%c0_41, %c3, %c0_42, %c0_43] : memref<1x4x8x8xbf16, #tpu.memory_space<vmem>>, vector<1x1x8x8xbf16>
    %62 = vector.shape_cast %61 : vector<1x1x8x8xbf16> to vector<8x8xbf16>
    %63 = vector.shape_cast %60 : vector<8x8xbf16> to vector<1x1x8x8xbf16>
    tpu.vector_store %arg5[%c0_41, %c3, %c0_42, %c0_43], %63 {strides = array<i32>} : memref<1x4x8x8xbf16, #tpu.memory_space<vmem>>, vector<1x1x8x8xbf16>,
    %64 = vector.extract_strided_slice %12 {offsets = [0, 24], sizes = [8, 8], strides = [1, 1]} : vector<8x32xf32> to vector<8x8xf32>
    %65 = arith.truncf %64 : vector<8x8xf32> to vector<8x8xbf16>
    %c0_44 = arith.constant 0 : index
    %c3_45 = arith.constant 3 : index
    %c0_46 = arith.constant 0 : index
    %c0_47 = arith.constant 0 : index
    %66 = vector.load %arg6[%c0_44, %c3_45, %c0_46, %c0_47] : memref<1x4x8x8xbf16, #tpu.memory_space<vmem>>, vector<1x1x8x8xbf16>
    %67 = vector.shape_cast %66 : vector<1x1x8x8xbf16> to vector<8x8xbf16>
    %68 = vector.shape_cast %65 : vector<8x8xbf16> to vector<1x1x8x8xbf16>
    tpu.vector_store %arg6[%c0_44, %c3_45, %c0_46, %c0_47], %68 {strides = array<i32>} : memref<1x4x8x8xbf16, #tpu.memory_space<vmem>>, vector<1x1x8x8xbf16>,
    %69 = vector.extract_strided_slice %13 {offsets = [0, 24], sizes = [8, 8], strides = [1, 1]} : vector<8x32xf32> to vector<8x8xf32>
    %70 = arith.truncf %69 : vector<8x8xf32> to vector<8x8xbf16>
    %c0_48 = arith.constant 0 : index
    %c3_49 = arith.constant 3 : index
    %c0_50 = arith.constant 0 : index
    %c0_51 = arith.constant 0 : index
    %71 = vector.load %arg7[%c0_48, %c3_49, %c0_50, %c0_51] : memref<1x4x8x8xbf16, #tpu.memory_space<vmem>>, vector<1x1x8x8xbf16>
    %72 = vector.shape_cast %71 : vector<1x1x8x8xbf16> to vector<8x8xbf16>
    %73 = vector.shape_cast %70 : vector<8x8xbf16> to vector<1x1x8x8xbf16>
    tpu.vector_store %arg7[%c0_48, %c3_49, %c0_50, %c0_51], %73 {strides = array<i32>} : memref<1x4x8x8xbf16, #tpu.memory_space<vmem>>, vector<1x1x8x8xbf16>,
    return
  }
  func.func @transform_0(%arg0: i32, %arg1: i32) -> (i32, i32, i32) {
    %c0_i32 = arith.constant 0 : i32
    %c0_i32_0 = arith.constant 0 : i32
    return %arg0, %arg1, %c0_i32 : i32, i32, i32
  }
  func.func @transform_1(%arg0: i32, %arg1: i32) -> (i32, i32) {
    %c0_i32 = arith.constant 0 : i32
    %c0_i32_0 = arith.constant 0 : i32
    %c0_i32_1 = arith.constant 0 : i32
    return %c0_i32, %c0_i32_0 : i32, i32
  }
  func.func @transform_2(%arg0: i32, %arg1: i32) -> (i32, i32) {
    %c0_i32 = arith.constant 0 : i32
    %c0_i32_0 = arith.constant 0 : i32
    %c0_i32_1 = arith.constant 0 : i32
    return %c0_i32, %c0_i32_0 : i32, i32
  }
  func.func @transform_3(%arg0: i32, %arg1: i32) -> (i32, i32, i32, i32) {
    %c0_i32 = arith.constant 0 : i32
    %c0_i32_0 = arith.constant 0 : i32
    %c0_i32_1 = arith.constant 0 : i32
    return %arg0, %c0_i32, %arg1, %c0_i32_0 : i32, i32, i32, i32
  }
  func.func @transform_4(%arg0: i32, %arg1: i32) -> (i32, i32, i32, i32) {
    %c0_i32 = arith.constant 0 : i32
    %c0_i32_0 = arith.constant 0 : i32
    %c0_i32_1 = arith.constant 0 : i32
    return %arg0, %c0_i32, %arg1, %c0_i32_0 : i32, i32, i32, i32
  }
  func.func @transform_5(%arg0: i32, %arg1: i32) -> (i32, i32, i32, i32) {
    %c0_i32 = arith.constant 0 : i32
    %c0_i32_0 = arith.constant 0 : i32
    %c0_i32_1 = arith.constant 0 : i32
    return %arg0, %c0_i32, %arg1, %c0_i32_0 : i32, i32, i32, i32
  }
}

</mosaic_0001>

<bundles_post_ra>
// kernel: tpu_custom_call.1
= control target key start
LH: loop header
LB: loop body
LE: loop exit
PB: predicated region body
PF: predicated region fallthrough
CT: control target
= control target key end

     0   :  { %s1241_s0 = inlined_call_operand.hbm [shape: f32[2,8,32], index: 0, kind: input, shape index: {}]   ;;  %s1242_s1 = inlined_call_operand.hbm [shape: f32[32,96], index: 1, kind: input, shape index: {}]   ;;  %s1243_s2 = inlined_call_operand.vmem [shape: f32[1,96], index: 2, kind: input, shape index: {}]   ;;  %s1244_s3 = inlined_call_operand.hbm [shape: bf16[2,4,8,8], index: 3, kind: output, shape index: {0}]   ;;  %s1245_s4 = inlined_call_operand.hbm [shape: bf16[2,4,8,8], index: 4, kind: output, shape index: {1}]   ;;  %s1246_s5 = inlined_call_operand.hbm [shape: bf16[2,4,8,8], index: 5, kind: output, shape index: {2}]  }
   0x1   :  { %1252 = sst [smem:[#allocation15_spill]] %s1241_s0 }
   0x2   :  { %11 = vsyncpa [#allocation3], 0 }
   0x3   :  { %13 = vsyncpa [#allocation3 + $0x1], 0 }
   0x4   :  { %14 = vsyncpa [#allocation6], 0 }
   0x5   :  { %15 = vsyncpa [#allocation4], 0 }
   0x6   :  { %17 = vsyncpa [#allocation4 + $0x1], 0 }
   0x7   :  { %18 = vsyncpa [#allocation9], 0 }
   0x8   :  { %20 = vsyncpa [#allocation9 + $0x1], 0  ;;  %s1000_s18 = smov 0   ;;  %s1002_s19 = smov 0  }
   0x9   :  { %s1004_s20 = smov 0   ;;  %s1006_s21 = smov 0  }
   0xa   :  { %s1008_s22 = smov 0   ;;  %s1010_s23 = smov 0  }
   0xb LB: > { %s1031_s24 = sadd.s32 4294967295, %s953_s23   ;;  %p614_p0 = scmp.ge.s32.totalorder %s953_s23, 1  ;;  %s953_s23 = sphi %s1010_s23, %s26_s23   ;;  %s949_s22 = sphi %s1008_s22, %s1266_s22   ;;  %s945_s21 = sphi %s1006_s21, %s1265_s21   ;;  %s941_s20 = sphi %s1004_s20, %s1264_s20   ;;  %s937_s19 = sphi %s1002_s19, %s1263_s19   ;;  %s933_s18 = sphi %s1000_s18, %s1262_s18  }
   0xc   : > { %p61_p1 = scmp.eq.s32.totalorder %s1031_s24, 0  ;;  %p197_p2 = scmp.lt.s32.totalorder %s953_s23, 3 }
   0xd   : > { %s208_s27 = sshll.u32 %s1242_s1, 4  ;;  %s955_s29 = smov [#allocation5]   ;;  %s209_s27 = int_to_ptr.hbm [resolvable:$true] %s208_s27 }
   0xe   : > { %p1039_p3 = pnand %p614_p0, %p197_p2  ;;  %s210_s30 = sshll.u32 %s955_s29, 4  ;;  %s211_s30 = int_to_ptr.vmem [resolvable:$true] %s210_s30 }
   0xf   : > { %p616_p6 = scmp.ge.s32.totalorder %s953_s23, 2  ;;  %s956_s6 = smov 128  }
  0x10   : > { %p661_p4 = pneg %p1039_p3  ;;  %s957_s7 = smov 8  }
  0x11   : > { %s1247_s8 = sadd.s32 4294967294, %s953_s23   ;;  %s38_s9 = sadd.s32 1, %s949_s22 }
  0x12   : > { %p662_p5 = pnand %p661_p4, %p61_p1  ;;  %s47_s10 = sadd.s32 1, %s941_s20 }
  0x13   : > { %p40_p7 = scmp.ge.s32.totalorder %s38_s9, 2  ;;  %p54_p8 = scmp.ne.s32.totalorder %s941_s20, %s937_s19 }
  0x14   : > { %664 = dma.hbm_to_vmem [thread:$0]  (!%p662_p5), %s209_s27, 512, %s211_s30, [#allocation6], %s956_s6, %s956_s6, %s957_s7  }
  0x15   : > { %p55_p9 = scmp.eq.s32.totalorder %s953_s23, 0  ;;  %p60_p10 = scmp.ne.s32.totalorder %s937_s19, %s933_s18 }
  0x16   : > { %s1268_s9 = smov (%p40_p7, %s38_s9), 0  ;;  %p128_p13 = scmp.eq.s32.totalorder %s1031_s24, 1 }
  0x17   : > { %p1058_p11 = por %p55_p9, %p54_p8  ;;  %p1064_p12 = por %p61_p1, %p60_p10 }
  0x18   : > { %s42_s13 = ssub.s32 %s949_s22, %s1268_s9  ;;  %p134_p2 = scmp.eq.s32.totalorder %s1247_s8, 1 }
  0x19   : > { %p45_p0 = scmp.eq.s32.totalorder %s42_s13, 0  ;;  %p1073_p4 = por %p128_p13, %p54_p8 }
  0x1a   : > { %p680_p5 = scmp.lt.s32.totalorder %s953_s23, 2  ;;  %p1081_p7 = por %p134_p2, %p60_p10 }
  0x1b   : > { %s1079_s15 = scalar_select %p45_p0, %s941_s20, %s47_s10  }
  0x1c   : > { %s227_s17 = sand.u32 1, %s941_s20   ;;  %s618_s26 = sshll.u32 %s949_s22, 3 }
  0x1d   : > { %s617_s25 = sshll.u32 %s227_s17, 3  ;;  %s1258_s0 = sld [smem:[#allocation15_spill]] }
  0x1e   : > { %s231_s6 = scalar_lea.vmem [#allocation2], %s617_s25  ;;  %p666_p8 = pnand %p680_p5, %p1058_p11 }
  0x1f   : > { %s240_s7 = sshll.u32 %s231_s6, 4  ;;  %s228_s10 = scalar_lea.sflag [#allocation3], %s227_s17  ;;  %s241_s7 = int_to_ptr.vmem [resolvable:$true] %s240_s7 }
  0x20   : > { %s1095_s8 = sand.u32 (!%p1039_p3), 1, %s937_s19  }
  0x21   : > { %249 = sbr.rel (%p1039_p3) target bundleno = 336 (0x150), region = 32  ;;  %s620_s27 = sshll.u32 (!%p1039_p3), %s1095_s8, 3 }
  0x22   : > { %s255_s25 = scalar_lea.vmem (!%p1039_p3), [#allocation2], %s620_s27 }
  0x23   : > { %s236_s30 = scalar_lea.hbm %s1258_s0, %s618_s26  ;;  %s252_s26 = scalar_lea.sflag (!%p1039_p3), [#allocation3], %s1095_s8 }
  0x24   : > { %s238_s13 = sshll.u32 %s236_s30, 4  ;;  %s239_s13 = int_to_ptr.hbm [resolvable:$true] %s238_s13 }
  0x25   : > { %668 = dma.hbm_to_vmem [thread:$0]  (!%p666_p8), %s239_s13, 128, %s241_s7, %s228_s10  }
  0x26   : > { %916 = dma.done.wait (%p1064_p12), %s252_s26, 128  }
  0x27   : > { %918 = vsyncadd (%p1064_p12), %s252_s26, 4294967168 }
  0x28   : > { %920 = dma.done.wait (%p61_p1), [#allocation6], 512  }
  0x29   : > { %922 = vsyncadd (%p61_p1), [#allocation6], 4294966784  ;;  %v303_v0 = vld [vmem:[#allocation5 + $0x10] sm:$0xff]  ;;  %v304_v1 = vld [vmem:[#allocation5 + $0x18] sm:$0xff]  ;;  %vm311_vm0 = vcmask 261120   ;;  %s1111_s12 = sshll.u32 %s1095_s8, 4 }
  0x2a   : > { %v301_v2 = vld [vmem:[#allocation5] sm:$0xff]  ;;  %v306_v3 = vpack.c.bf16 %v304_v1, %v303_v0  ;;  %v302_v4 = vld [vmem:[#allocation5 + $0x8] sm:$0xff]  ;;  %v299_v6 = vld [vmem:[%s255_s25] sm:$0xff]  ;;  %vm330_vm1 = vcmask 60416   ;;  %s1248_s17 = smov 64   ;;  %s959_s29 = smov 80  }
  0x2b   : > { %v305_v5 = vpack.c.bf16 %v302_v4, %v301_v2  ;;  %v300_v7 = vpack.c.bf16 %v299_v6, %v299_v6  ;;  %v746_v8 = vld [vmem:[%s1243_s2] ss:$0 sm:$0xff]  ;;  %s960_s30 = smov 96   ;;  %s1115_s6 = scalar_lea.vmem [#allocation7], %s1111_s12 }
  0x2c   : > { %321 = vmatpush.bf16.msra.mxu0 %v306_v3  ;;  %s961_s7 = smov 72   ;;  %s962_s13 = smov 120  }
  0x2d   : > { %s963_s10 = smov 88   ;;  %s964_s27 = smov 112  }
  0x2e   : > { %s965_s26 = smov 48   ;;  %s966_s25 = smov 56  }
  0x2f   : > { %s967_s28 = smov 40   ;;  %s968_s11 = smov 104  }
  0x30   : > { %322 = vmatpush.bf16.msra.mxu0 %v305_v5 }
  0x33   : > { %625 = vmatmul.msk.bf16.vlgmr.msra.gmra.mxu0 %vm311_vm0, %v300_v7 }
  0xb0   : > { %v324_v9 = vpop.f32.mrf.mxu0 }
  0xb1   : > { %v325_v10 = vadd.f32 %v746_v8, %v324_v9 }
  0xb3   : > { %v328_v11 = vmul.f32 0.35355338, %v325_v10  ;;  %v332_v12 = vpack.c.bf16 %v325_v10, %v325_v10 }
  0xb5   : > { %v329_v13 = vpack.c.bf16 %v328_v11, %v328_v11  ;;  %338 = vrot.lane.b32.xlu2 %v332_v12, %s1248_s17  ;;  %363 = vrot.lane.b32.xlu1 %v332_v12, %s959_s29  ;;  %s1120_s29 = scalar_lea.vmem [#allocation10], %s1111_s12 }
  0xb6   : > { %334 = vrot.lane.b32.xlu0 %v332_v12, %s960_s30  ;;  %s1129_s30 = sshll.u32 %s945_s21, 4 }
  0xb7   : > { %331 = vst.msk [vmem:[%s1115_s6] sm:$0xf] %vm330_vm1, %v329_v13 }
  0xb8   : > { %v326_v14 = vpop.f32.mrf.mxu0 }
  0xbd   : > { %378 = vrot.lane.b32.xlu1 %v332_v12, %s961_s7  ;;  %343 = vrot.lane.b32.xlu2 %v329_v13, %s962_s13  ;;  %s290_s7 = scalar_lea.vmem [#allocation8], %s1111_s12 }
  0xbe   : > { %348 = vrot.lane.b32.xlu0 %v332_v12, %s963_s10  ;;  %s827_s10 = scalar_lea.hbm %s1245_s4, 32 }
  0xc5   : > { %358 = vrot.lane.b32.xlu1 %v329_v13, %s964_s27  ;;  %368 = vrot.lane.b32.xlu2 %v332_v12, %s965_s26  ;;  %s429_s27 = scalar_lea.hbm %s1245_s4, %s1129_s30  ;;  %s430_s26 = sshll.u32 %s290_s7, 4  ;;  %s431_s26 = int_to_ptr.vmem [resolvable:$true] %s430_s26 }
  0xc6   : > { %353 = vrot.lane.b32.xlu0 %v332_v12, %s966_s25  ;;  %s393_s25 = sand.u32 1, %s1031_s24  }
  0xc7   : > { %s1141_s21 = scalar_lea.sflag [#allocation9], %s393_s25 }
  0xcd   : > { %383 = vrot.lane.b32.xlu1 %v332_v12, %s967_s28  ;;  %s432_s28 = sshll.u32 %s429_s27, 4  ;;  %s433_s28 = int_to_ptr.hbm [resolvable:$true] %s432_s28 }
  0xce   : > { %373 = vrot.lane.b32.xlu0 %v329_v13, %s968_s11  ;;  %s821_s12 = sshra.s32 %s433_s28, 4  ;;  %s822_s12 = int_to_ptr.hbm [resolvable:$true] %s821_s12 }
  0xcf   : > { %s823_s11 = scalar_lea.hbm %s822_s12, 16  ;;  %p828_p10 = scmp.lt.s32.totalorder %s822_s12, %s1245_s4 }
  0xd0   : > { %p824_p1 = scmp.ne.s32.totalorder %s822_s12, %s823_s11  ;;  %p829_p11 = scmp.lt.s32.totalorder %s827_s10, %s823_s11 }
  0xd2   : > { %p825_p3 = pnand %p824_p1, %p1073_p4  ;;  %p830_p12 = por %p829_p11, %p828_p10 }
  0xd4   : > { %p826_p9 = pneg %p825_p3 }
  0xd6   : > { %p831_p13 = pnand %p830_p12, %p826_p9 }
 0x10f   : > { %v339_v15 = vpop.permute.xlu2 %338 }
 0x110   : > { %341 = vst.msk [vmem:[%s1120_s29] sm:$0xf] %vm330_vm1, %v339_v15 }
 0x117   : > { %v344_v16 = vpop.permute.xlu2 %343 }
 0x118   : > { %626 = vst.msk [vmem:[%s1115_s6 + $0x4] sm:$0xf] %vm330_vm1, %v344_v16 }
 0x11f   : > { %v369_v17 = vpop.permute.xlu2 %368 }
 0x120   : > { %631 = vst.msk [vmem:[%s1120_s29 + $0x8] sm:$0xf] %vm330_vm1, %v369_v17 }
 0x127   : > { %v364_v18 = vpop.permute.xlu1 %363 }
 0x128   : > { %630 = vst.msk [vmem:[%s290_s7 + $0x8] sm:$0xf] %vm330_vm1, %v364_v18  ;;  %v335_v19 = vpop.permute.xlu0 %334 }
 0x129   : > { %337 = vst.msk [vmem:[%s290_s7] sm:$0xf] %vm330_vm1, %v335_v19 }
 0x12f   : > { %v379_v20 = vpop.permute.xlu1 %378 }
 0x130   : > { %633 = vst.msk [vmem:[%s290_s7 + $0xc] sm:$0xf] %vm330_vm1, %v379_v20  ;;  %v349_v21 = vpop.permute.xlu0 %348 }
 0x131   : > { %627 = vst.msk [vmem:[%s290_s7 + $0x4] sm:$0xf] %vm330_vm1, %v349_v21 }
 0x132   : > { %834 = shalt.err (!%p831_p13)
}
 0x133   : > { %s1250_s7 = smov 4   ;;  %s1259_s25 = smov 64  }
 0x134   : > { %656 = dma.vmem_to_hbm [thread:$0]  (%p1073_p4), %s431_s26, 256, %s433_s28, %s1141_s21, %s1259_s25, %s1259_s25, %s1250_s7  }
 0x135   : > { %s411_s11 = scalar_lea.hbm %s1244_s3, %s1129_s30  ;;  %s447_s10 = scalar_lea.hbm %s1246_s5, %s1129_s30 }
 0x136   : > { %s412_s27 = sshll.u32 %s1115_s6, 4  ;;  %s1170_s0 = sshll.u32 %s411_s11, 4  ;;  %s413_s27 = int_to_ptr.vmem [resolvable:$true] %s412_s27  ;;  %s415_s0 = int_to_ptr.hbm [resolvable:$true] %s1170_s0 }
 0x137   : > { %v359_v22 = vpop.permute.xlu1 %358  ;;  %s448_s26 = sshll.u32 %s1120_s29, 4  ;;  %s1173_s28 = sshll.u32 %s447_s10, 4  ;;  %s1176_s26 = int_to_ptr.vmem [resolvable:$true] %s448_s26  ;;  %s451_s28 = int_to_ptr.hbm [resolvable:$true] %s1173_s28 }
 0x138   : > { %v354_v23 = vpop.permute.xlu0 %353  ;;  %629 = vst.msk [vmem:[%s1115_s6 + $0x8] sm:$0xf] %vm330_vm1, %v359_v22  ;;  %s389_s30 = scalar_lea.sflag [#allocation4], %s1095_s8  ;;  %s849_s17 = sshra.s32 %s415_s0, 4  ;;  %s850_s17 = int_to_ptr.hbm [resolvable:$true] %s849_s17 }
 0x139   : > { %628 = vst.msk [vmem:[%s1120_s29 + $0x4] sm:$0xf] %vm330_vm1, %v354_v23  ;;  %s851_s12 = scalar_lea.hbm %s850_s17, 16  ;;  %s855_s24 = scalar_lea.hbm %s1244_s3, 32 }
 0x13a   : > { %p852_p0 = scmp.ne.s32.totalorder %s850_s17, %s851_s12  ;;  %p856_p8 = scmp.lt.s32.totalorder %s850_s17, %s1244_s3 }
 0x13b   : > { %p857_p1 = scmp.lt.s32.totalorder %s855_s24, %s851_s12 }
 0x13c   : > { %p853_p2 = pnand %p852_p0, %p1073_p4 }
 0x13d   : > { %p858_p3 = por %p857_p1, %p856_p8 }
 0x13e   : > { %p854_p5 = pneg %p853_p2 }
 0x13f   : > { %v384_v24 = vpop.permute.xlu1 %383 }
 0x140   : > { %v374_v25 = vpop.permute.xlu0 %373  ;;  %634 = vst.msk [vmem:[%s1120_s29 + $0xc] sm:$0xf] %vm330_vm1, %v384_v24  ;;  %p859_p9 = pnand %p858_p3, %p854_p5 }
 0x141   : > { %632 = vst.msk [vmem:[%s1115_s6 + $0xc] sm:$0xf] %vm330_vm1, %v374_v25 }
 0x142   : > { %862 = shalt.err (!%p859_p9)
}
 0x143   : > { %s1260_s8 = smov 4   ;;  %s877_s6 = sshra.s32 %s451_s28, 4  ;;  %s878_s6 = int_to_ptr.hbm [resolvable:$true] %s877_s6 }
 0x144   : > { %655 = dma.vmem_to_hbm [thread:$0]  (%p1073_p4), %s413_s27, 256, %s415_s0, %s389_s30, %s1259_s25, %s1259_s25, %s1260_s8  }
 0x145   : > { %s879_s29 = scalar_lea.hbm %s878_s6, 16  ;;  %s883_s12 = scalar_lea.hbm %s1246_s5, 32 }
 0x146   : > { %p880_p10 = scmp.ne.s32.totalorder %s878_s6, %s879_s29  ;;  %p884_p13 = scmp.lt.s32.totalorder %s878_s6, %s1246_s5 }
 0x147   : > { %p885_p0 = scmp.lt.s32.totalorder %s883_s12, %s879_s29 }
 0x148   : > { %p881_p11 = pnand %p880_p10, %p1073_p4 }
 0x149   : > { %p886_p2 = por %p885_p0, %p884_p13 }
 0x14a   : > { %p882_p12 = pneg %p881_p11 }
 0x14c   : > { %p887_p5 = pnand %p886_p2, %p882_p12 }
 0x14e   : > { %890 = shalt.err (!%p887_p5)
}
 0x14f   : > { %657 = dma.vmem_to_hbm [thread:$0]  (%p1073_p4), %s1176_s26, 256, %s451_s28, %s1141_s21, %s1259_s25, %s1259_s25, %s1260_s8  }
 0x150 PF: > { %s465_s0 = sand.u32 1, %s933_s18   ;;  %p670_p8 = pnand %p616_p6, %p1081_p7 }
 0x151   : > { %s466_s27 = scalar_lea.sflag [#allocation4], %s465_s0 }
 0x152   : > { %p671_p1 = pneg %p670_p8 }
 0x154   : > { %924 = dma.done.wait (%p671_p1), %s466_s27, 256  }
 0x155   : > { %926 = vsyncadd (%p671_p1), %s466_s27, 4294967040  ;;  %s1261_s14 = sadd.s32 4294967294, %s953_s23  }
 0x156   : > { %s475_s30 = sand.u32 1, %s1261_s14  }
 0x157   : > { %s476_s24 = scalar_lea.sflag [#allocation9], %s475_s30 }
 0x158   : > { %928 = dma.done.wait (%p671_p1), %s476_s24, 512  }
 0x159   : > { %930 = vsyncadd (%p671_p1), %s476_s24, 4294966784  ;;  %s26_s23 = sadd.s32 1, %s953_s23   ;;  %s1262_s18 = smov %s937_s19 }
 0x15a   : > { %p23_p4 = scmp.ge.s32.totalorder %s26_s23, 4   ;;  %s1263_s19 = smov %s941_s20 }
 0x15b   : > { %s1264_s20 = smov %s1079_s15  ;;  %s1265_s21 = smov %s949_s22 }
 0x15c   : > { %s1266_s22 = smov %s1268_s9  ;;  %25 = sbr.rel (!%p23_p4) target bundleno = 11 (0xb), region = 122 }
 0x161   :  { %492 = vsyncpa [#allocation3], 1 }
 0x162   :  { %494 = vsyncpa [#allocation3 + $0x1], 1 }
 0x163   :  { %495 = vsyncpa [#allocation6], 1 }
 0x164   :  { %496 = vsyncpa [#allocation4], 1 }
 0x165   :  { %498 = vsyncpa [#allocation4 + $0x1], 1 }
 0x166   :  { %499 = vsyncpa [#allocation9], 1 }
 0x167   :  { %501 = vsyncpa [#allocation9 + $0x1], 1 }

</bundles_post_ra>
